<compile_context>
chip_gen: v6e
topology: v6e:2x2x1
jax: 0.10.0
libtpu: 0.0.40
codegen_flags: <defaults>
</compile_context>

<pallas_src>
import functools
import math

import jax
import jax.numpy as jnp
from jax.experimental import pallas as pl
from jax.experimental.pallas import tpu as pltpu


def _timestep_mlp_kernel(t_ref, w1_ref, b1_ref, w2_ref, b2_ref, o_ref,
                         *, half, freq_scale, compute_dtype):
    # ---- sinusoidal timestep embedding (flip_sin_to_cos=True, even dim) ----
    t = t_ref[...]                                                   # (N, 1) f32
    # freqs[j] = exp(-log(max_period) * j / (half - shift)), built in-kernel.
    idx = jax.lax.broadcasted_iota(jnp.int32, (1, half), 1).astype(jnp.float32)
    freqs = jnp.exp(idx * freq_scale)                                # (1, half)
    arg = t * freqs                                                  # (N, half) f32
    # flip_sin_to_cos=True -> emb = [cos | sin]; emb.to(dtype) before Linear1.
    cos = jnp.cos(arg).astype(compute_dtype)
    sin = jnp.sin(arg).astype(compute_dtype)

    # ---- Linear1 as cos @ W1[:half] + sin @ W1[half:] (no concat, no wrapper
    # split; static slices on a sublane-aligned boundary are free) ----
    w1_cos = w1_ref[:half, :]
    w1_sin = w1_ref[half:, :]
    h = jnp.dot(cos, w1_cos, preferred_element_type=jnp.float32)
    h = h + jnp.dot(sin, w1_sin, preferred_element_type=jnp.float32)
    h = h + b1_ref[...].astype(jnp.float32)

    # ---- SiLU in f32 on VPU/EUP ----
    h = h * jax.nn.sigmoid(h)

    # ---- Linear2, one lane-dense column tile of the output ----
    out = jnp.dot(h.astype(compute_dtype), w2_ref[...],
                  preferred_element_type=jnp.float32)
    out = out + b2_ref[...].astype(jnp.float32)
    o_ref[...] = out.astype(o_ref.dtype)


# Conservative per-kernel VMEM budget: safe under v7x's 64 MiB physical /
# 32 MiB default scoped VMEM (and trivially under v5e/v6e's 128 MiB).
_VMEM_BUDGET_BYTES = 24 << 20
_DEFAULT_SCOPED_VMEM = 32 << 20


def _vmem_bytes(n, dim_in, dim_out, tile, itemsize):
    """Worst-case VMEM footprint assuming every input/output is double-buffered."""
    return (2 * itemsize * (dim_in * dim_out      # W1 (resident, constant index)
                            + dim_out             # b1
                            + dim_out * tile      # W2 column tile
                            + tile                # b2 column tile
                            + n * tile)           # output tile
            + 2 * 4 * n)                          # timesteps (f32)


def _pick_col_tile(n, dim_in, dim_out, itemsize):
    """Return (tile, num_tiles).  Single step unless VMEM forces tiling."""
    # Small timestep MLPs are DMA-/overhead-bound: a serial grid just re-does
    # Linear1 per tile and adds per-step overhead; a v7x parallel split
    # duplicates the constant-index W1/b1/t DMA.  Only tile when needed.
    if dim_out % 128 != 0:
        return dim_out, 1          # full-extent block is always legal
    if _vmem_bytes(n, dim_in, dim_out, dim_out, itemsize) <= _VMEM_BUDGET_BYTES:
        return dim_out, 1
    # DiT-scale dim_out: lane-dense tiles, even tile count (balances the two
    # v7x TensorCores), biggest tile that fits the budget.
    for tile in (4096, 2048, 1024, 512, 256, 128):
        if (dim_out % tile == 0 and (dim_out // tile) % 2 == 0
                and _vmem_bytes(n, dim_in, dim_out, tile, itemsize)
                <= _VMEM_BUDGET_BYTES):
            return tile, dim_out // tile
    return 128, dim_out // 128


def timestep_embeddings(timestep, params, dim_in, dim_out, dtype=jnp.bfloat16,
                        max_period=10000, downscale_freq_shift=0.0):
    """timestep: (N,) float array.  Returns (N, dim_out) in `dtype`.

    params = (w1, b1, w2, b2) with weights stored as (in_features, out_features),
    i.e. transposed w.r.t. PyTorch's (out, in) Linear layout.  All params MUST
    already be in `dtype` (pre-cast once at model load, not per call).
    """
    n = timestep.shape[0]
    half = dim_in // 2
    assert dim_in % 2 == 0, "odd embedding_dim (zero-pad branch) not implemented"
    # bf16 packs 16 rows per sublane tile -> in-kernel split of W1 must land
    # on a tile boundary to be a free view.
    assert half % 16 == 0, "dim_in//2 must be a multiple of 16"

    w1, b1, w2, b2 = params
    itemsize = jnp.dtype(dtype).itemsize
    for name, p in (("w1", w1), ("b1", b1), ("w2", w2), ("b2", b2)):
        assert p.dtype == jnp.dtype(dtype), (
            f"param {name} must be pre-cast to {dtype} (got {p.dtype}); "
            "per-call casts cost more HBM traffic than the kernel itself")
    assert w1.shape == (dim_in, dim_out)
    assert w2.shape == (dim_out, dim_out)

    freq_scale = -math.log(max_period) / (half - downscale_freq_shift)
    t_col = timestep.astype(jnp.float32)[:, None]                   # (N, 1)
    b1_row = b1.reshape(1, dim_out)
    b2_row = b2.reshape(1, dim_out)

    tile_n, num_tiles = _pick_col_tile(n, dim_in, dim_out, itemsize)
    grid = (num_tiles,)

    kernel = functools.partial(_timestep_mlp_kernel, half=half,
                               freq_scale=freq_scale, compute_dtype=dtype)

    # Advisory cost: constant-index blocks (t, W1, b1) are fetched once per
    # TensorCore when the grid is split across cores; Linear1 is recomputed
    # per tile.
    const_copies = 1 if num_tiles == 1 else 2
    const_bytes = (t_col.size * 4 + w1.size * itemsize + dim_out * itemsize)
    tiled_bytes = (w2.size + dim_out + n * dim_out) * itemsize
    cost = pl.CostEstimate(
        flops=num_tiles * 2 * n * dim_in * dim_out + 2 * n * dim_out * dim_out,
        transcendentals=num_tiles * (half + n * dim_in) + n * dim_out,
        bytes_accessed=const_copies * const_bytes + tiled_bytes,
    )

    need = _vmem_bytes(n, dim_in, dim_out, tile_n, itemsize)
    vmem_limit = None
    if need + (need // 2) > _DEFAULT_SCOPED_VMEM:
        vmem_limit = min(need + (need // 2) + (1 << 20), 60 << 20)

    return pl.pallas_call(
        kernel,
        out_shape=jax.ShapeDtypeStruct((n, dim_out), dtype),
        grid=grid,
        in_specs=[
            pl.BlockSpec((n, 1), lambda j: (0, 0)),              # timesteps (const)
            pl.BlockSpec((dim_in, dim_out), lambda j: (0, 0)),   # W1 (const)
            pl.BlockSpec((1, dim_out), lambda j: (0, 0)),        # b1 (const)
            pl.BlockSpec((dim_out, tile_n), lambda j: (0, j)),   # W2 column tile
            pl.BlockSpec((1, tile_n), lambda j: (0, j)),         # b2 column tile
        ],
        out_specs=pl.BlockSpec((n, tile_n), lambda j: (0, j)),   # lane-dense out tile
        compiler_params=pltpu.CompilerParams(
            dimension_semantics=(
                ("arbitrary",) if num_tiles == 1 else ("parallel",)),
            vmem_limit_bytes=vmem_limit),
        cost_estimate=cost,
    )(t_col, w1, b1_row, w2, b2_row)


def init_params(key, dim_in, dim_out, dtype=jnp.bfloat16):
    """Deterministic synthetic params, pre-cast to `dtype` (the contract).
    Weights stored as (in_features, out_features)."""
    k1, k2, k3, k4 = jax.random.split(key, 4)
    w1 = (jax.random.normal(k1, (dim_in, dim_out), jnp.float32) * 0.02).astype(dtype)
    b1 = (jax.random.normal(k2, (dim_out,), jnp.float32) * 0.02).astype(dtype)
    w2 = (jax.random.normal(k3, (dim_out, dim_out), jnp.float32) * 0.02).astype(dtype)
    b2 = (jax.random.normal(k4, (dim_out,), jnp.float32) * 0.02).astype(dtype)
    return (w1, b1, w2, b2)


def reference(timestep, params, dim_in, dim_out, dtype=jnp.bfloat16,
              max_period=10000, downscale_freq_shift=0.0):
    """Pure-JAX reference mirroring the PyTorch module (weights/emb in `dtype`)."""
    half = dim_in // 2
    freqs = jnp.exp(jnp.arange(half, dtype=jnp.float32)
                    * (-math.log(max_period) / (half - downscale_freq_shift)))
    arg = timestep.astype(jnp.float32)[:, None] * freqs[None, :]
    emb = jnp.concatenate([jnp.sin(arg), jnp.cos(arg)], axis=-1)
    emb = jnp.concatenate([emb[:, half:], emb[:, :half]], axis=-1)  # flip_sin_to_cos
    emb = emb.astype(dtype)
    w1, b1, w2, b2 = params
    h = jnp.dot(emb, w1.astype(dtype), preferred_element_type=jnp.float32)
    h = h + b1.astype(jnp.float32)
    h = h * jax.nn.sigmoid(h)
    out = jnp.dot(h.astype(dtype), w2.astype(dtype),
                  preferred_element_type=jnp.float32)
    out = out + b2.astype(jnp.float32)
    return out.astype(dtype)


if __name__ == "__main__":
    N = 8          # batch of timesteps (batch caller-side CFG branches together)
    DIM_IN = 256   # sinusoidal embedding dim (time_proj num_channels)
    DIM_OUT = 512  # MLP hidden/output dim
    DTYPE = jnp.bfloat16

    key = jax.random.PRNGKey(0)
    k_t, k_p = jax.random.split(key)
    timestep = jax.random.uniform(k_t, (N,), jnp.float32, 0.0, 1000.0)
    params = init_params(k_p, DIM_IN, DIM_OUT, DTYPE)

    out = timestep_embeddings(timestep, params, DIM_IN, DIM_OUT, DTYPE)
    out = jax.block_until_ready(out)

    ref = reference(timestep, params, DIM_IN, DIM_OUT, DTYPE)
    assert out.shape == (N, DIM_OUT) and out.dtype == DTYPE
    assert jnp.allclose(out.astype(jnp.float32), ref.astype(jnp.float32),
                        atol=1e-2, rtol=1e-2), "mismatch vs reference"

    print("KERNEL_OK")
</pallas_src>

<mosaic_0001>
module attributes {stable_mosaic.version = 11 : i64} {
  func.func @_timestep_mlp_kernel(%arg0: i32, %arg1: memref<8x1xf32, #tpu.memory_space<vmem>>, %arg2: memref<256x512xbf16, #tpu.memory_space<vmem>>, %arg3: memref<1x512xbf16, #tpu.memory_space<vmem>>, %arg4: memref<512x512xbf16, #tpu.memory_space<vmem>>, %arg5: memref<1x512xbf16, #tpu.memory_space<vmem>>, %arg6: memref<8x512xbf16, #tpu.memory_space<vmem>>) attributes {dimension_semantics = [#tpu.dimension_semantics<arbitrary>], iteration_bounds = array<i64: 1>, scalar_prefetch = 0 : i64, scratch_operands = 0 : i64, tpu.core_type = #tpu.core_type<tc>, window_params = [{pipeline_mode = #tpu.pipeline_mode<synchronous>, transform_indices = @transform_0, window_bounds = array<i64: 8, 1>}, {pipeline_mode = #tpu.pipeline_mode<synchronous>, transform_indices = @transform_1, window_bounds = array<i64: 256, 512>}, {pipeline_mode = #tpu.pipeline_mode<synchronous>, transform_indices = @transform_2, window_bounds = array<i64: 1, 512>}, {transform_indices = @transform_3, window_bounds = array<i64: 512, 512>}, {transform_indices = @transform_4, window_bounds = array<i64: 1, 512>}, {transform_indices = @transform_5, window_bounds = array<i64: 8, 512>}]} {
    %c0 = arith.constant 0 : index
    %c0_0 = arith.constant 0 : index
    %0 = vector.load %arg1[%c0, %c0_0] : memref<8x1xf32, #tpu.memory_space<vmem>>, vector<8x1xf32>
    %1 = tpu.iota {dimensions = array<i32: 1>} : vector<1x128xi32>
    %2 = arith.sitofp %1 : vector<1x128xi32> to vector<1x128xf32>
    %cst = arith.constant -0.0719557852 : f32
    %3 = vector.broadcast %cst : f32 to vector<1x128xf32>
    %4 = arith.mulf %2, %3 : vector<1x128xf32>
    %5 = math.exp %4 : vector<1x128xf32>
    %6 = vector.broadcast %0 : vector<8x1xf32> to vector<8x128xf32>
    %7 = vector.broadcast %5 : vector<1x128xf32> to vector<8x128xf32>
    %8 = arith.mulf %6, %7 : vector<8x128xf32>
    %9 = math.cos %8 : vector<8x128xf32>
    %10 = arith.truncf %9 : vector<8x128xf32> to vector<8x128xbf16>
    %11 = math.sin %8 : vector<8x128xf32>
    %12 = arith.truncf %11 : vector<8x128xf32> to vector<8x128xbf16>
    %c0_1 = arith.constant 0 : index
    %c0_2 = arith.constant 0 : index
    %13 = vector.load %arg2[%c0_1, %c0_2] : memref<256x512xbf16, #tpu.memory_space<vmem>>, vector<128x512xbf16>
    %c128 = arith.constant 128 : index
    %c0_3 = arith.constant 0 : index
    %14 = vector.load %arg2[%c128, %c0_3] : memref<256x512xbf16, #tpu.memory_space<vmem>>, vector<128x512xbf16>
    %cst_4 = arith.constant dense<0.000000e+00> : vector<8x512xf32>
    %15 = tpu.matmul %10, %13, %cst_4 {dimension_numbers = #tpu.dot_dimension_numbers<[1], [0], [0], [1], [0, 0, 1, 1], [], []>} : vector<8x128xbf16>, vector<128x512xbf16>, vector<8x512xf32> -> vector<8x512xf32>
    %cst_5 = arith.constant dense<0.000000e+00> : vector<8x512xf32>
    %16 = tpu.matmul %12, %14, %cst_5 {dimension_numbers = #tpu.dot_dimension_numbers<[1], [0], [0], [1], [0, 0, 1, 1], [], []>} : vector<8x128xbf16>, vector<128x512xbf16>, vector<8x512xf32> -> vector<8x512xf32>
    %17 = arith.addf %15, %16 : vector<8x512xf32>
    %c0_6 = arith.constant 0 : index
    %c0_7 = arith.constant 0 : index
    %18 = vector.load %arg3[%c0_6, %c0_7] : memref<1x512xbf16, #tpu.memory_space<vmem>>, vector<1x512xbf16>
    %19 = arith.extf %18 : vector<1x512xbf16> to vector<1x512xf32>
    %20 = vector.broadcast %19 : vector<1x512xf32> to vector<8x512xf32>
    %21 = arith.addf %17, %20 : vector<8x512xf32>
    %22 = arith.negf %21 : vector<8x512xf32>
    %23 = math.exp %22 : vector<8x512xf32>
    %cst_8 = arith.constant 1.000000e+00 : f32
    %24 = vector.broadcast %cst_8 : f32 to vector<8x512xf32>
    %25 = arith.addf %24, %23 : vector<8x512xf32>
    %26 = arith.divf %24, %25 : vector<8x512xf32>
    %27 = arith.mulf %21, %26 : vector<8x512xf32>
    %28 = arith.truncf %27 : vector<8x512xf32> to vector<8x512xbf16>
    %c0_9 = arith.constant 0 : index
    %c0_10 = arith.constant 0 : index
    %29 = vector.load %arg4[%c0_9, %c0_10] : memref<512x512xbf16, #tpu.memory_space<vmem>>, vector<512x512xbf16>
    %cst_11 = arith.constant dense<0.000000e+00> : vector<8x512xf32>
    %30 = tpu.matmul %28, %29, %cst_11 {dimension_numbers = #tpu.dot_dimension_numbers<[1], [0], [0], [1], [0, 0, 1, 1], [], []>} : vector<8x512xbf16>, vector<512x512xbf16>, vector<8x512xf32> -> vector<8x512xf32>
    %c0_12 = arith.constant 0 : index
    %c0_13 = arith.constant 0 : index
    %31 = vector.load %arg5[%c0_12, %c0_13] : memref<1x512xbf16, #tpu.memory_space<vmem>>, vector<1x512xbf16>
    %32 = arith.extf %31 : vector<1x512xbf16> to vector<1x512xf32>
    %33 = vector.broadcast %32 : vector<1x512xf32> to vector<8x512xf32>
    %34 = arith.addf %30, %33 : vector<8x512xf32>
    %35 = arith.truncf %34 : vector<8x512xf32> to vector<8x512xbf16>
    %c0_14 = arith.constant 0 : index
    %c0_15 = arith.constant 0 : index
    %36 = vector.load %arg6[%c0_14, %c0_15] : memref<8x512xbf16, #tpu.memory_space<vmem>>, vector<8x512xbf16>
    tpu.vector_store %arg6[%c0_14, %c0_15], %35 {strides = array<i32>} : memref<8x512xbf16, #tpu.memory_space<vmem>>, vector<8x512xbf16>,
    return
  }
  func.func @transform_0(%arg0: i32) -> (i32, i32) {
    %c0_i32 = arith.constant 0 : i32
    %c0_i32_0 = arith.constant 0 : i32
    %c0_i32_1 = arith.constant 0 : i32
    return %c0_i32, %c0_i32_0 : i32, i32
  }
  func.func @transform_1(%arg0: i32) -> (i32, i32) {
    %c0_i32 = arith.constant 0 : i32
    %c0_i32_0 = arith.constant 0 : i32
    %c0_i32_1 = arith.constant 0 : i32
    return %c0_i32, %c0_i32_0 : i32, i32
  }
  func.func @transform_2(%arg0: i32) -> (i32, i32) {
    %c0_i32 = arith.constant 0 : i32
    %c0_i32_0 = arith.constant 0 : i32
    %c0_i32_1 = arith.constant 0 : i32
    return %c0_i32, %c0_i32_0 : i32, i32
  }
  func.func @transform_3(%arg0: i32) -> (i32, i32) {
    %c0_i32 = arith.constant 0 : i32
    %c0_i32_0 = arith.constant 0 : i32
    return %c0_i32, %arg0 : i32, i32
  }
  func.func @transform_4(%arg0: i32) -> (i32, i32) {
    %c0_i32 = arith.constant 0 : i32
    %c0_i32_0 = arith.constant 0 : i32
    return %c0_i32, %arg0 : i32, i32
  }
  func.func @transform_5(%arg0: i32) -> (i32, i32) {
    %c0_i32 = arith.constant 0 : i32
    %c0_i32_0 = arith.constant 0 : i32
    return %c0_i32, %arg0 : i32, i32
  }
}

</mosaic_0001>

<bundles_post_ra>
// kernel: tpu_custom_call.1
= control target key start
LH: loop header
LB: loop body
LE: loop exit
PB: predicated region body
PF: predicated region fallthrough
CT: control target
= control target key end

     0   :  { %10 = vsyncpa [#allocation3], 0  ;;  %s2645_s0 = inlined_call_operand.vmem [shape: f32[8,1], index: 0, kind: input, shape index: {}]   ;;  %s2646_s1 = inlined_call_operand.hbm [shape: bf16[256,512], index: 1, kind: input, shape index: {}]   ;;  %s2647_s2 = inlined_call_operand.vmem [shape: bf16[1,512], index: 2, kind: input, shape index: {}]   ;;  %s2648_s3 = inlined_call_operand.hbm [shape: bf16[512,512], index: 3, kind: input, shape index: {}]   ;;  %s2649_s4 = inlined_call_operand.vmem [shape: bf16[1,512], index: 4, kind: input, shape index: {}]   ;;  %s2650_s5 = inlined_call_operand.hbm [shape: bf16[8,512], index: 5, kind: output, shape index: {}]  }
   0x1   :  { %11 = vsyncpa [#allocation6], 0 }
   0x2   :  { %12 = vsyncpa [#allocation4], 0  ;;  %s2501_s18 = smov [#allocation2]  }
   0x3   :  { %s20_s19 = sshll.u32 %s2501_s18, 4  ;;  %s21_s19 = int_to_ptr.vmem [resolvable:$true] %s20_s19 }
   0x4   :  { %s2443_s20 = scalar_lea.vmem %s21_s19, 8192  ;;  %p2448_p1 = scmp.lt.s32.totalorder %s21_s19, %s21_s19 }
   0x5   :  { %p2444_p0 = scmp.ne.s32.totalorder %s21_s19, %s2443_s20  ;;  %p2449_p2 = scmp.lt.s32.totalorder %s2443_s20, %s2443_s20 }
   0x7   :  { %p2450_p3 = por %p2449_p2, %p2448_p1 }
   0x9   :  { %p2451_p4 = pnand %p2450_p3, %p2444_p0 }
   0xb   :  { %2454 = shalt.err (!%p2451_p4)
}
   0xc   :  { %s2502_s21 = smov 256   ;;  %s2503_s22 = smov 16  }
   0xd   :  { %26 = dma.hbm_to_vmem [thread:$0]  %s2646_s1, 8192, %s21_s19, [#allocation3], %s2502_s21, %s2502_s21, %s2503_s22  }
   0xe   :  { %s2504_s25 = smov [#allocation5]  }
   0xf   :  { %s34_s26 = sshll.u32 %s2504_s25, 4  ;;  %s35_s26 = int_to_ptr.vmem [resolvable:$true] %s34_s26 }
  0x10   :  { %s2463_s27 = scalar_lea.vmem %s35_s26, 16384  ;;  %p2468_p6 = scmp.lt.s32.totalorder %s35_s26, %s35_s26 }
  0x11   :  { %p2464_p5 = scmp.ne.s32.totalorder %s35_s26, %s2463_s27  ;;  %p2469_p7 = scmp.lt.s32.totalorder %s2463_s27, %s2463_s27 }
  0x13   :  { %p2470_p8 = por %p2469_p7, %p2468_p6 }
  0x15   :  { %p2471_p9 = pnand %p2470_p8, %p2464_p5 }
  0x17   :  { %2474 = shalt.err (!%p2471_p9)
}
  0x18   :  { %40 = dma.hbm_to_vmem [thread:$0]  %s2648_s3, 16384, %s35_s26, [#allocation6], %s2502_s21, %s2502_s21, %s2503_s22  }
  0x19   :  { %2495 = dma.done.wait [#allocation3], 8192  }
  0x1a   :  { %2496 = vsyncadd [#allocation3], 4294959104 }
  0x1b   :  { %2497 = dma.done.wait [#allocation6], 16384  }
  0x1c   :  { %2498 = vsyncadd [#allocation6], 4294950912  ;;  %v2505_v0 = vmov 0   ;;  %v50_v1 = vld [vmem:[%s2645_s0] sm:$0xff]  ;;  %v2127_v3 = vld [vmem:[#allocation2 + $0x1ec] ss:$16 sps:$4 sm:$0xff]   ;;  %v51_v36 = vlaneseq }
  0x1d   :  { %2124 = vset.pattern.permute.xlu0 %v2505_v0  ;;  %528 = vmatprep.mubr.bf16.mxu0 %v2505_v0  ;;  %v2125_v2 = vld [vmem:[#allocation2 + $0x1e4] ss:$16 sps:$4 sm:$0xff]   ;;  %v2129_v4 = vld [vmem:[#allocation2 + $0x1e0] ss:$16 sps:$4 sm:$0xff]   ;;  %v2130_v5 = vld [vmem:[#allocation2 + $0x1e8] ss:$16 sps:$4 sm:$0xff]  }
  0x1e   :  { %569 = vmatprep.mubr.bf16.mxu1 %v2505_v0  ;;  %59 = vperm.xlu0 %2124, %v50_v1   ;;  %v2131_v6 = vld [vmem:[#allocation2 + $0x1c4] ss:$16 sps:$4 sm:$0xff]   ;;  %v2133_v7 = vld [vmem:[#allocation2 + $0x1cc] ss:$16 sps:$4 sm:$0xff]   ;;  %v2135_v8 = vld [vmem:[#allocation2 + $0x1c0] ss:$16 sps:$4 sm:$0xff]  }
  0x1f   :  { %496 = vmatprep.subr.bf16.mxu0 %v2125_v2  ;;  %537 = vmatprep.subr.bf16.mxu1 %v2127_v3  ;;  %v2136_v9 = vld [vmem:[#allocation2 + $0x1c8] ss:$16 sps:$4 sm:$0xff]   ;;  %v2137_v10 = vld [vmem:[#allocation2 + $0x1a4] ss:$16 sps:$4 sm:$0xff]   ;;  %v2139_v11 = vld [vmem:[#allocation2 + $0x1ac] ss:$16 sps:$4 sm:$0xff]  }
  0x20   :  { %497 = vmatpush1.bf16.msra.mxu0 %v2129_v4  ;;  %538 = vmatpush1.bf16.msra.mxu1 %v2130_v5  ;;  %v2141_v12 = vld [vmem:[#allocation2 + $0x1a0] ss:$16 sps:$4 sm:$0xff]   ;;  %v2142_v13 = vld [vmem:[#allocation2 + $0x1a8] ss:$16 sps:$4 sm:$0xff]   ;;  %v2143_v14 = vld [vmem:[#allocation2 + $0x184] ss:$16 sps:$4 sm:$0xff]  }
  0x21   :  { %498 = vmatprep.subr.bf16.mxu0 %v2131_v6  ;;  %539 = vmatprep.subr.bf16.mxu1 %v2133_v7  ;;  %v2145_v15 = vld [vmem:[#allocation2 + $0x18c] ss:$16 sps:$4 sm:$0xff]   ;;  %v2147_v16 = vld [vmem:[#allocation2 + $0x180] ss:$16 sps:$4 sm:$0xff]   ;;  %v2148_v17 = vld [vmem:[#allocation2 + $0x188] ss:$16 sps:$4 sm:$0xff]  }
  0x22   :  { %v2149_v18 = vld [vmem:[#allocation2 + $0x164] ss:$16 sps:$4 sm:$0xff]   ;;  %v2151_v19 = vld [vmem:[#allocation2 + $0x16c] ss:$16 sps:$4 sm:$0xff]   ;;  %v2153_v20 = vld [vmem:[#allocation2 + $0x160] ss:$16 sps:$4 sm:$0xff]  }
  0x23   :  { %v2154_v21 = vld [vmem:[#allocation2 + $0x168] ss:$16 sps:$4 sm:$0xff]   ;;  %v2155_v22 = vld [vmem:[#allocation2 + $0x144] ss:$16 sps:$4 sm:$0xff]   ;;  %v2157_v23 = vld [vmem:[#allocation2 + $0x14c] ss:$16 sps:$4 sm:$0xff]  }
  0x24   :  { %499 = vmatpush1.bf16.msra.mxu0 %v2135_v8  ;;  %540 = vmatpush1.bf16.msra.mxu1 %v2136_v9  ;;  %v2159_v24 = vld [vmem:[#allocation2 + $0x140] ss:$16 sps:$4 sm:$0xff]   ;;  %v2160_v25 = vld [vmem:[#allocation2 + $0x148] ss:$16 sps:$4 sm:$0xff]   ;;  %v2161_v26 = vld [vmem:[#allocation2 + $0x124] ss:$16 sps:$4 sm:$0xff]  }
  0x25   :  { %500 = vmatprep.subr.bf16.mxu0 %v2137_v10  ;;  %541 = vmatprep.subr.bf16.mxu1 %v2139_v11  ;;  %v2163_v27 = vld [vmem:[#allocation2 + $0x12c] ss:$16 sps:$4 sm:$0xff]   ;;  %v2165_v28 = vld [vmem:[#allocation2 + $0x120] ss:$16 sps:$4 sm:$0xff]   ;;  %v2166_v29 = vld [vmem:[#allocation2 + $0x128] ss:$16 sps:$4 sm:$0xff]  }
  0x26   :  { %v2167_v30 = vld [vmem:[#allocation2 + $0x104] ss:$16 sps:$4 sm:$0xff]   ;;  %v2169_v31 = vld [vmem:[#allocation2 + $0x10c] ss:$16 sps:$4 sm:$0xff]   ;;  %v2171_v32 = vld [vmem:[#allocation2 + $0x100] ss:$16 sps:$4 sm:$0xff]  }
  0x27   :  { %v2172_v33 = vld [vmem:[#allocation2 + $0x108] ss:$16 sps:$4 sm:$0xff]   ;;  %v2175_v34 = vld [vmem:[#allocation2 + $0xe4] ss:$16 sps:$4 sm:$0xff]   ;;  %v2178_v35 = vld [vmem:[#allocation2 + $0xec] ss:$16 sps:$4 sm:$0xff]  }
  0x28   :  { %501 = vmatpush1.bf16.msra.mxu0 %v2141_v12  ;;  %542 = vmatpush1.bf16.msra.mxu1 %v2142_v13  ;;  %v52_v37 = vand.u32 127, %v51_v36  ;;  %v2506_v54 = vmov 683565275   ;;  %v2507_v56 = vmov 2475754826  }
  0x29   :  { %502 = vmatprep.subr.bf16.mxu0 %v2143_v14  ;;  %543 = vmatprep.subr.bf16.mxu1 %v2145_v15  ;;  %v2508_v59 = vmov 2131351028   ;;  %v2509_v62 = vmov 2102212464   ;;  %v2510_v2 = vmov 920167782  }
  0x2a   :  { %v53_v38 = vcvt.s32.f32 %v52_v37  ;;  %v2511_v5 = vmov 1326507024  }
  0x2c   :  { %503 = vmatpush1.bf16.msra.mxu0 %v2147_v16  ;;  %544 = vmatpush1.bf16.msra.mxu1 %v2148_v17  ;;  %v54_v39 = vmul.f32 -0.071955785, %v53_v38 }
  0x2d   :  { %504 = vmatprep.subr.bf16.mxu0 %v2149_v18  ;;  %545 = vmatprep.subr.bf16.mxu1 %v2151_v19 }
  0x2e   :  { %v55_v40 = vmul.f32 1.442695, %v54_v39 }
  0x30   :  { %505 = vmatpush1.bf16.msra.mxu0 %v2153_v20  ;;  %546 = vmatpush1.bf16.msra.mxu1 %v2154_v21  ;;  %2413 = vpow2.f32 %v55_v40 }
  0x31   :  { %506 = vmatprep.subr.bf16.mxu0 %v2155_v22  ;;  %547 = vmatprep.subr.bf16.mxu1 %v2157_v23 }
  0x34   :  { %507 = vmatpush1.bf16.msra.mxu0 %v2159_v24  ;;  %548 = vmatpush1.bf16.msra.mxu1 %v2160_v25 }
  0x35   :  { %508 = vmatprep.subr.bf16.mxu0 %v2161_v26  ;;  %549 = vmatprep.subr.bf16.mxu1 %v2163_v27 }
  0x38   :  { %509 = vmatpush1.bf16.msra.mxu0 %v2165_v28  ;;  %550 = vmatpush1.bf16.msra.mxu1 %v2166_v29 }
  0x39   :  { %510 = vmatprep.subr.bf16.mxu0 %v2167_v30  ;;  %551 = vmatprep.subr.bf16.mxu1 %v2169_v31 }
  0x3c   :  { %511 = vmatpush1.bf16.msra.mxu0 %v2171_v32  ;;  %552 = vmatpush1.bf16.msra.mxu1 %v2172_v33 }
  0x3d   :  { %738 = vmatprep.subr.bf16.mxu0 %v2175_v34  ;;  %779 = vmatprep.subr.bf16.mxu1 %v2178_v35  ;;  %v2414_v41 = vpop.eup %2413 }
  0x99   :  { %v60_v42 = vpop.permute.xlu0 %59 }
  0x9a   :  { %v2556_v43 = vmul.f32 %v2414_v41, %v60_v42 }
  0x9c   :  { %v66_v44 = vand.u32 2139095040, %v2556_v43  ;;  %v63_v48 = vand.u32 2147483647, %v2556_v43  ;;  %vm65_vm7 = vcmp.lt.s32.totalorder %v2556_v43, 0  ;;  %vm155_vm12 = vweird.f32 %v2556_v43 }
  0x9e   :  { %v67_v45 = vshrl.u32 %v66_v44, 23  ;;  %v70_v51 = vand.u32 8388607, %v63_v48  ;;  %vm64_vm8 = vcmp.le.f32.partialorder %v63_v48, 0.7853982 }
  0xa0   :  { %v1900_v46 = vadd.s32 4294967169, %v67_v45  ;;  %v71_v7 = vor.u32 8388608, %v70_v51 }
  0xa2   :  { %v73_v47 = vadd.s32 1, %v1900_v46  ;;  %v111_v21 = vshll.u32 %v71_v7, 8 }
  0xa4   :  { %vm74_vm0 = vcmp.gt.s32.totalorder %v73_v47, 0 }
  0xa5   :  { %v75_v49 = vsel %vm74_vm0, %v73_v47, 0 }
  0xa6   :  { %v77_v50 = vand.u32 31, %v75_v49  ;;  %v76_v53 = vshrl.u32 %v75_v49, 5 }
  0xa8   :  { %v78_v52 = vsub.s32 32, %v77_v50  ;;  %v80_v55 = vshll.u32 %v2506_v54, %v77_v50  ;;  %v83_v57 = vshll.u32 %v2507_v56, %v77_v50  ;;  %v86_v61 = vshll.u32 %v2508_v59, %v77_v50 }
  0xa9   :  { %v89_v1 = vshll.u32 %v2509_v62, %v77_v50  ;;  %v92_v4 = vshll.u32 %v2510_v2, %v77_v50  ;;  %vm95_vm1 = vcmp.lt.s32.totalorder %v76_v53, 1  ;;  %vm98_vm2 = vcmp.lt.s32.totalorder %v76_v53, 4 }
  0xaa   :  { %v81_v58 = vshrl.u32 %v2507_v56, %v78_v52  ;;  %v84_v60 = vshrl.u32 %v2508_v59, %v78_v52  ;;  %v87_v63 = vshrl.u32 %v2509_v62, %v78_v52  ;;  %v90_v3 = vshrl.u32 %v2510_v2, %v78_v52 }
  0xab   :  { %v93_v6 = vshrl.u32 %v2511_v5, %v78_v52  ;;  %v79_v16 = vshrl.u32 %v2506_v54, %v78_v52  ;;  %vm97_vm3 = vcmp.lt.s32.totalorder %v76_v53, 3  ;;  %vm96_vm4 = vcmp.lt.s32.totalorder %v76_v53, 2 }
  0xac   :  { %v82_v8 = vor.u32 %v81_v58, %v80_v55  ;;  %v85_v9 = vor.u32 %v84_v60, %v83_v57  ;;  %v88_v10 = vor.u32 %v87_v63, %v86_v61  ;;  %v91_v11 = vor.u32 %v90_v3, %v89_v1 }
  0xad   :  { %v94_v12 = vor.u32 %v93_v6, %v92_v4 }
  0xae   :  { %v100_v13 = vsel %vm98_vm2, %v88_v10, 2102212464  ;;  %v103_v14 = vsel %vm95_vm1, %v82_v8, %v85_v9  ;;  %v107_v15 = vsel %vm95_vm1, %v85_v9, %v88_v10  ;;  %v104_v17 = vsel %vm98_vm2, %v91_v11, 920167782 }
  0xaf   :  { %v108_v18 = vsel %vm98_vm2, %v94_v12, 1326507024  ;;  %v105_v19 = vsel %vm97_vm3, %v88_v10, %v104_v17  ;;  %v99_v22 = vsel %vm95_vm1, %v79_v16, %v82_v8  ;;  %v101_v23 = vsel %vm97_vm3, %v85_v9, %v100_v13  ;;  %v2173_v10 = vld [vmem:[#allocation2 + $0xe0] ss:$16 sps:$4 sm:$0xff]   ;;  %v2182_v17 = vld [vmem:[#allocation2 + $0xc8] ss:$16 sps:$4 sm:$0xff]  }
  0xb0   :  { %v109_v20 = vsel %vm97_vm3, %v91_v11, %v108_v18  ;;  %v106_v24 = vsel %vm96_vm4, %v103_v14, %v105_v19  ;;  %v102_v30 = vsel %vm96_vm4, %v99_v22, %v101_v23  ;;  %v2176_v11 = vld [vmem:[#allocation2 + $0xe8] ss:$16 sps:$4 sm:$0xff]   ;;  %v2181_v14 = vld [vmem:[#allocation2 + $0xc4] ss:$16 sps:$4 sm:$0xff]   ;;  %v2179_v16 = vld [vmem:[#allocation2 + $0xc0] ss:$16 sps:$4 sm:$0xff]  }
  0xb1   :  { %v110_v25 = vsel %vm96_vm4, %v107_v15, %v109_v20  ;;  %v2565_v28 = vmul.u32.u64.low %v111_v21, %v106_v24  ;;  %v2566_v29 = vmul.u32.u64.high %v111_v21, %v106_v24, %v2565_v28  ;;  %v118_v32 = vmul.u32 %v111_v21, %v102_v30  ;;  %v2184_v15 = vld [vmem:[#allocation2 + $0xcc] ss:$16 sps:$4 sm:$0xff]   ;;  %v2187_v18 = vld [vmem:[#allocation2 + $0xa4] ss:$16 sps:$4 sm:$0xff]   ;;  %v2185_v20 = vld [vmem:[#allocation2 + $0xa0] ss:$16 sps:$4 sm:$0xff]  }
  0xb2   :  { %v2562_v26 = vmul.u32.u64.low %v111_v21, %v110_v25  ;;  %v2563_v27 = vmul.u32.u64.high %v111_v21, %v110_v25, %v2562_v26  ;;  %v2190_v19 = vld [vmem:[#allocation2 + $0xac] ss:$16 sps:$4 sm:$0xff]   ;;  %v2188_v21 = vld [vmem:[#allocation2 + $0xa8] ss:$16 sps:$4 sm:$0xff]   ;;  %v2193_v22 = vld [vmem:[#allocation2 + $0x84] ss:$16 sps:$4 sm:$0xff]  }
  0xb3   :  { %v121_v31 = vadd.s32 1, %v2566_v29  ;;  %v2196_v23 = vld [vmem:[#allocation2 + $0x8c] ss:$16 sps:$4 sm:$0xff]   ;;  %v2191_v24 = vld [vmem:[#allocation2 + $0x80] ss:$16 sps:$4 sm:$0xff]  }
  0xb4   :  { %vm120_vm5 = vc.u32 %v2563_v27, %v2565_v28  ;;  %v119_v46 = vadd.s32 %v2565_v28, %v2563_v27  ;;  %v2194_v25 = vld [vmem:[#allocation2 + $0x88] ss:$16 sps:$4 sm:$0xff]   ;;  %v2199_v26 = vld [vmem:[#allocation2 + $0x64] ss:$16 sps:$4 sm:$0xff]   ;;  %v2202_v27 = vld [vmem:[#allocation2 + $0x6c] ss:$16 sps:$4 sm:$0xff]  }
  0xb5   :  { %v122_v33 = vsel %vm120_vm5, %v121_v31, %v2566_v29  ;;  %v2197_v28 = vld [vmem:[#allocation2 + $0x60] ss:$16 sps:$4 sm:$0xff]   ;;  %v2205_v29 = vld [vmem:[#allocation2 + $0x44] ss:$16 sps:$4 sm:$0xff]   ;;  %v2208_v30 = vld [vmem:[#allocation2 + $0x4c] ss:$16 sps:$4 sm:$0xff]  }
  0xb6   :  { %v123_v34 = vadd.s32 %v122_v33, %v118_v32  ;;  %v2203_v32 = vld [vmem:[#allocation2 + $0x40] ss:$16 sps:$4 sm:$0xff]   ;;  %v2206_v33 = vld [vmem:[#allocation2 + $0x48] ss:$16 sps:$4 sm:$0xff]  }
  0xb8   :  { %v124_v35 = vadd.s32 536870912, %v123_v34 }
  0xba   :  { %v125_v37 = vshrl.u32 %v124_v35, 30  ;;  %v2214_v35 = vld [vmem:[#allocation2 + $0x2c] ss:$16 sps:$4 sm:$0xff]  }
  0xbc   :  { %v126_v38 = vshll.u32 %v125_v37, 30  ;;  %v149_v60 = vsub.s32 4, %v125_v37 }
  0xbe   :  { %v127_v39 = vsub.s32 %v123_v34, %v126_v38  ;;  %v150_v63 = vsel %vm65_vm7, %v149_v60, %v125_v37  ;;  %v2211_v34 = vld [vmem:[#allocation2 + $0x24] ss:$16 sps:$4 sm:$0xff]   ;;  %v2236_v60 = vld [vmem:[#allocation5 + $0x2a0] ss:$16 sps:$4 sm:$0xff]  }
  0xbf   :  { %v152_v1 = vsel %vm64_vm8, 0, %v150_v63  ;;  %v2239_v63 = vld [vmem:[#allocation5 + $0x80] ss:$16 sps:$4 sm:$0xff]  }
  0xc0   :  { %v129_v40 = vsub.s32 0, %v127_v39  ;;  %v260_v2 = vadd.s32 3, %v152_v1  ;;  %v156_v31 = vand.u32 3, %v152_v1  ;;  %v2242_v1 = vld [vmem:[#allocation5 + $0x280] ss:$16 sps:$4 sm:$0xff]  }
  0xc2   :  { %v1901_v41 = vmin.u32 %v129_v40, %v127_v39  ;;  %v261_v3 = vand.u32 3, %v260_v2  ;;  %vm158_vm13 = vcmp.eq.s32.totalorder %v156_v31, 0  ;;  %vm161_vm14 = vcmp.eq.s32.totalorder %v156_v31, 2  ;;  %v2212_v40 = vld [vmem:[#allocation2 + $0x28] ss:$16 sps:$4 sm:$0xff]  }
  0xc3   :  { %vm157_vm15 = vcmp.lt.s32.totalorder %v156_v31, 2  ;;  %v2247_v2 = vld [vmem:[#allocation5 + $0x64] ss:$16 sps:$4 sm:$0xff]   ;;  %v2290_v31 = vld [vmem:[#allocation5 + $0x380] ss:$16 sps:$4 sm:$0xff]  }
  0xc4   :  { %v131_v42 = vclz %v1901_v41  ;;  %vm266_vm9 = vcmp.eq.s32.totalorder %v261_v3, 2  ;;  %vm263_vm10 = vcmp.eq.s32.totalorder %v261_v3, 0  ;;  %vm262_vm11 = vcmp.lt.s32.totalorder %v261_v3, 2  ;;  %v2217_v41 = vld [vmem:[#allocation2 + $0x4] ss:$16 sps:$4 sm:$0xff]  }
  0xc5   :  { %v2250_v3 = vld [vmem:[#allocation5 + $0x264] ss:$16 sps:$4 sm:$0xff]  }
  0xc6   :  { %v1902_v44 = vadd.s32 4294967294, %v131_v42  ;;  %v2220_v42 = vld [vmem:[#allocation2 + $0xc] ss:$16 sps:$4 sm:$0xff]  }
  0xc8   :  { %vm1903_vm6 = vcmp.lt.s32.totalorder %v1902_v44, 0 }
  0xc9   :  { %v134_v45 = vsel %vm1903_vm6, 0, %v1902_v44 }
  0xca   :  { %v135_v47 = vsub.s32 32, %v134_v45  ;;  %v139_v49 = vsub.s32 4294967266, %v134_v45  ;;  %v136_v50 = vshll.u32 %v127_v39, %v134_v45  ;;  %v2209_v39 = vld [vmem:[#allocation2 + $0x20] ss:$16 sps:$4 sm:$0xff]  }
  0xcb   :  { %v2215_v45 = vld [vmem:[#allocation2] ss:$16 sps:$4 sm:$0xff]  }
  0xcc   :  { %v137_v51 = vshrl.u32 %v119_v46, %v135_v47  ;;  %v140_v52 = vadd.s32 127, %v139_v49  ;;  %v2218_v46 = vld [vmem:[#allocation2 + $0x8] ss:$16 sps:$4 sm:$0xff]  }
  0xce   :  { %v138_v53 = vor.u32 %v137_v51, %v136_v50  ;;  %v141_v54 = vshll.u32 %v140_v52, 23  ;;  %v2221_v50 = vld [vmem:[#allocation5 + $0xe0] ss:$16 sps:$4 sm:$0xff]   ;;  %v2223_v51 = vld [vmem:[#allocation5 + $0xe4] ss:$16 sps:$4 sm:$0xff]  }
  0xcf   :  { %v2224_v52 = vld [vmem:[#allocation5 + $0x2e0] ss:$16 sps:$4 sm:$0xff]  }
  0xd0   :  { %v142_v55 = vor.u32 4788187, %v141_v54  ;;  %v145_v57 = vcvt.s32.f32 %v138_v53  ;;  %v2226_v53 = vld [vmem:[#allocation5 + $0x2e4] ss:$16 sps:$4 sm:$0xff]  }
  0xd1   :  { %v2229_v54 = vld [vmem:[#allocation5 + $0xc4] ss:$16 sps:$4 sm:$0xff]  }
  0xd2   :  { %v143_v56 = vand.u32 2147483647, %v142_v55  ;;  %v2232_v55 = vld [vmem:[#allocation5 + $0x2c4] ss:$16 sps:$4 sm:$0xff]  }
  0xd4   :  { %v146_v58 = vmul.f32 %v145_v57, %v143_v56  ;;  %v2227_v56 = vld [vmem:[#allocation5 + $0xc0] ss:$16 sps:$4 sm:$0xff]  }
  0xd5   :  { %v2230_v57 = vld [vmem:[#allocation5 + $0x2c0] ss:$16 sps:$4 sm:$0xff]  }
  0xd6   :  { %v147_v59 = vxor.u32 2147483648, %v146_v58 }
  0xd8   :  { %v148_v61 = vsel %vm65_vm7, %v147_v59, %v146_v58  ;;  %v2238_v58 = vld [vmem:[#allocation5 + $0x2a4] ss:$16 sps:$4 sm:$0xff]   ;;  %v2233_v59 = vld [vmem:[#allocation5 + $0xa0] ss:$16 sps:$4 sm:$0xff]  }
  0xd9   :  { %v151_v62 = vsel %vm64_vm8, %v2556_v43, %v148_v61  ;;  %v2235_v43 = vld [vmem:[#allocation5 + $0xa4] ss:$16 sps:$4 sm:$0xff]  }
  0xda   :  { %2415 = vcosq.f32 %v151_v62  ;;  %v2241_v61 = vld [vmem:[#allocation5 + $0x84] ss:$16 sps:$4 sm:$0xff]  }
  0xdb   :  { %2417 = vsinq.f32 %v151_v62  ;;  %v2244_v62 = vld [vmem:[#allocation5 + $0x284] ss:$16 sps:$4 sm:$0xff]  }
  0xe7   :  { %v2576_v4 = vpop.eup %2415 }
  0xe8   :  { %v2578_v5 = vpop.eup %2417  ;;  %v162_v6 = vxor.u32 2147483648, %v2576_v4 }
  0xe9   :  { %v159_v7 = vxor.u32 2147483648, %v2578_v5 }
  0xea   :  { %v268_v48 = vsel %vm266_vm9, %v162_v6, %v2578_v5  ;;  %v163_v38 = vsel %vm161_vm14, %v162_v6, %v2578_v5  ;;  %v2248_v5 = vld [vmem:[#allocation5 + $0x260] ss:$16 sps:$4 sm:$0xff]   ;;  %v2253_v6 = vld [vmem:[#allocation5 + $0x44] ss:$16 sps:$4 sm:$0xff]  }
  0xeb   :  { %v265_v8 = vsel %vm263_vm10, %v2576_v4, %v159_v7  ;;  %v160_v37 = vsel %vm158_vm13, %v2576_v4, %v159_v7  ;;  %v2245_v4 = vld [vmem:[#allocation5 + $0x60] ss:$16 sps:$4 sm:$0xff]   ;;  %v2256_v7 = vld [vmem:[#allocation5 + $0x244] ss:$16 sps:$4 sm:$0xff]  }
  0xec   :  { %v269_v9 = vsel %vm262_vm11, %v265_v8, %v268_v48  ;;  %v164_v44 = vsel %vm157_vm15, %v160_v37, %v163_v38  ;;  %v2251_v48 = vld [vmem:[#allocation5 + $0x40] ss:$16 sps:$4 sm:$0xff]   ;;  %v2301_v37 = vld [vmem:[#allocation5 + $0x144] ss:$16 sps:$4 sm:$0xff]  }
  0xed   :  { %v270_v12 = vsel %vm155_vm12, nan, %v269_v9  ;;  %v165_v47 = vsel %vm155_vm12, nan, %v164_v44  ;;  %v2254_v8 = vld [vmem:[#allocation5 + $0x240] ss:$16 sps:$4 sm:$0xff]   ;;  %v2259_v9 = vld [vmem:[#allocation5 + $0x24] ss:$16 sps:$4 sm:$0xff]  }
  0xee   :  { %v271_v13 = vpack.c.bf16 %v270_v12, %v270_v12  ;;  %v166_v49 = vpack.c.bf16 %v165_v47, %v165_v47  ;;  %v2260_v12 = vld [vmem:[#allocation5 + $0x220] ss:$16 sps:$4 sm:$0xff]   ;;  %v2304_v38 = vld [vmem:[#allocation5 + $0x344] ss:$16 sps:$4 sm:$0xff]  }
  0xef   :  { %v2305_v44 = vld [vmem:[#allocation5 + $0x120] ss:$16 sps:$4 sm:$0xff]   ;;  %v2316_v47 = vld [vmem:[#allocation5 + $0x304] ss:$16 sps:$4 sm:$0xff]  }
  0xf0   :  { %529 = vmatmul.mubr.bf16.vlgmr.msra.gmra.mxu0 %v271_v13  ;;  %570 = vmatmul.mubr.bf16.vlgmr.msra.gmra.mxu1 %v271_v13  ;;  %v2265_v13 = vld [vmem:[#allocation5 + $0x4] ss:$16 sps:$4 sm:$0xff]  }
  0xf1   :  { %739 = vmatpush1.bf16.msra.mxu0 %v2173_v10  ;;  %780 = vmatpush1.bf16.msra.mxu1 %v2176_v11  ;;  %v2262_v10 = vld [vmem:[#allocation5 + $0x224] ss:$16 sps:$4 sm:$0xff]   ;;  %v2257_v11 = vld [vmem:[#allocation5 + $0x20] ss:$16 sps:$4 sm:$0xff]  }
  0xf2   :  { %740 = vmatprep.subr.bf16.mxu0 %v2181_v14  ;;  %781 = vmatprep.subr.bf16.mxu1 %v2184_v15  ;;  %v2268_v14 = vld [vmem:[#allocation5 + $0x204] ss:$16 sps:$4 sm:$0xff]   ;;  %v2263_v15 = vld [vmem:[#allocation5] ss:$16 sps:$4 sm:$0xff]  }
  0xf3   :  { %770 = vmatprep.mubr.bf16.mxu0 %v2505_v0  ;;  %811 = vmatprep.mubr.bf16.mxu1 %v2505_v0  ;;  %v2200_v0 = vld [vmem:[#allocation2 + $0x68] ss:$16 sps:$4 sm:$0xff]  }
  0xf5   :  { %741 = vmatpush1.bf16.msra.mxu0 %v2179_v16  ;;  %782 = vmatpush1.bf16.msra.mxu1 %v2182_v17  ;;  %v2266_v16 = vld [vmem:[#allocation5 + $0x200] ss:$16 sps:$4 sm:$0xff]   ;;  %v2271_v17 = vld [vmem:[#allocation5 + $0x1e4] ss:$16 sps:$4 sm:$0xff]  }
  0xf6   :  { %742 = vmatprep.subr.bf16.mxu0 %v2187_v18  ;;  %783 = vmatprep.subr.bf16.mxu1 %v2190_v19  ;;  %v2274_v18 = vld [vmem:[#allocation5 + $0x3e4] ss:$16 sps:$4 sm:$0xff]   ;;  %v2269_v19 = vld [vmem:[#allocation5 + $0x1e0] ss:$16 sps:$4 sm:$0xff]  }
  0xf9   :  { %743 = vmatpush1.bf16.msra.mxu0 %v2185_v20  ;;  %784 = vmatpush1.bf16.msra.mxu1 %v2188_v21  ;;  %v2272_v20 = vld [vmem:[#allocation5 + $0x3e0] ss:$16 sps:$4 sm:$0xff]   ;;  %v2277_v21 = vld [vmem:[#allocation5 + $0x1c4] ss:$16 sps:$4 sm:$0xff]  }
  0xfa   :  { %744 = vmatprep.subr.bf16.mxu0 %v2193_v22  ;;  %785 = vmatprep.subr.bf16.mxu1 %v2196_v23  ;;  %v2280_v22 = vld [vmem:[#allocation5 + $0x3c4] ss:$16 sps:$4 sm:$0xff]   ;;  %v2275_v23 = vld [vmem:[#allocation5 + $0x1c0] ss:$16 sps:$4 sm:$0xff]  }
  0xfd   :  { %745 = vmatpush1.bf16.msra.mxu0 %v2191_v24  ;;  %786 = vmatpush1.bf16.msra.mxu1 %v2194_v25  ;;  %v2278_v24 = vld [vmem:[#allocation5 + $0x3c0] ss:$16 sps:$4 sm:$0xff]   ;;  %v2283_v25 = vld [vmem:[#allocation5 + $0x1a4] ss:$16 sps:$4 sm:$0xff]  }
  0xfe   :  { %746 = vmatprep.subr.bf16.mxu0 %v2199_v26  ;;  %787 = vmatprep.subr.bf16.mxu1 %v2202_v27  ;;  %v2286_v26 = vld [vmem:[#allocation5 + $0x3a4] ss:$16 sps:$4 sm:$0xff]   ;;  %v2281_v27 = vld [vmem:[#allocation5 + $0x1a0] ss:$16 sps:$4 sm:$0xff]  }
 0x101   :  { %747 = vmatpush1.bf16.msra.mxu0 %v2197_v28  ;;  %788 = vmatpush1.bf16.msra.mxu1 %v2200_v0  ;;  %v2284_v28 = vld [vmem:[#allocation5 + $0x3a0] ss:$16 sps:$4 sm:$0xff]   ;;  %v2289_v0 = vld [vmem:[#allocation5 + $0x184] ss:$16 sps:$4 sm:$0xff]  }
 0x102   :  { %748 = vmatprep.subr.bf16.mxu0 %v2205_v29  ;;  %789 = vmatprep.subr.bf16.mxu1 %v2208_v30  ;;  %v2292_v29 = vld [vmem:[#allocation5 + $0x384] ss:$16 sps:$4 sm:$0xff]   ;;  %v2287_v30 = vld [vmem:[#allocation5 + $0x180] ss:$16 sps:$4 sm:$0xff]  }
 0x105   :  { %749 = vmatpush1.bf16.msra.mxu0 %v2203_v32  ;;  %790 = vmatpush1.bf16.msra.mxu1 %v2206_v33  ;;  %v2295_v32 = vld [vmem:[#allocation5 + $0x164] ss:$16 sps:$4 sm:$0xff]  }
 0x106   :  { %750 = vmatprep.subr.bf16.mxu0 %v2211_v34  ;;  %791 = vmatprep.subr.bf16.mxu1 %v2214_v35  ;;  %v2298_v33 = vld [vmem:[#allocation5 + $0x364] ss:$16 sps:$4 sm:$0xff]   ;;  %v2293_v34 = vld [vmem:[#allocation5 + $0x160] ss:$16 sps:$4 sm:$0xff]  }
 0x107   :  { %v2296_v35 = vld [vmem:[#allocation5 + $0x360] ss:$16 sps:$4 sm:$0xff]  }
 0x109   :  { %751 = vmatpush1.bf16.msra.mxu0 %v2209_v39  ;;  %792 = vmatpush1.bf16.msra.mxu1 %v2212_v40  ;;  %v2299_v39 = vld [vmem:[#allocation5 + $0x140] ss:$16 sps:$4 sm:$0xff]  }
 0x10a   :  { %752 = vmatprep.subr.bf16.mxu0 %v2217_v41  ;;  %793 = vmatprep.subr.bf16.mxu1 %v2220_v42  ;;  %v2302_v40 = vld [vmem:[#allocation5 + $0x340] ss:$16 sps:$4 sm:$0xff]   ;;  %v2307_v41 = vld [vmem:[#allocation5 + $0x124] ss:$16 sps:$4 sm:$0xff]  }
 0x10b   :  { %v2310_v42 = vld [vmem:[#allocation5 + $0x324] ss:$16 sps:$4 sm:$0xff]  }
 0x10d   :  { %753 = vmatpush1.bf16.msra.mxu0 %v2215_v45  ;;  %794 = vmatpush1.bf16.msra.mxu1 %v2218_v46  ;;  %v2308_v45 = vld [vmem:[#allocation5 + $0x320] ss:$16 sps:$4 sm:$0xff]   ;;  %v2313_v46 = vld [vmem:[#allocation5 + $0x104] ss:$16 sps:$4 sm:$0xff]  }
 0x10e   :  { %1702 = vmatprep.subr.bf16.mxu0 %v2223_v51  ;;  %1743 = vmatprep.subr.bf16.mxu1 %v2226_v53  ;;  %v2319_v51 = vld [vmem:[#allocation5 + $0xec] ss:$16 sps:$4 sm:$0xff]  }
 0x110   :  { %771 = vmatmul.mubr.bf16.vlgmr.msra.gmra.mxu0 %v166_v49  ;;  %812 = vmatmul.mubr.bf16.vlgmr.msra.gmra.mxu1 %v166_v49  ;;  %v2311_v49 = vld [vmem:[#allocation5 + $0x100] ss:$16 sps:$4 sm:$0xff]  }
 0x111   :  { %1703 = vmatpush1.bf16.msra.mxu0 %v2221_v50  ;;  %1744 = vmatpush1.bf16.msra.mxu1 %v2224_v52  ;;  %v2314_v50 = vld [vmem:[#allocation5 + $0x300] ss:$16 sps:$4 sm:$0xff]   ;;  %v2322_v52 = vld [vmem:[#allocation5 + $0x2ec] ss:$16 sps:$4 sm:$0xff]  }
 0x112   :  { %1704 = vmatprep.subr.bf16.mxu0 %v2229_v54  ;;  %1745 = vmatprep.subr.bf16.mxu1 %v2232_v55 }
 0x115   :  { %1705 = vmatpush1.bf16.msra.mxu0 %v2227_v56  ;;  %1746 = vmatpush1.bf16.msra.mxu1 %v2230_v57 }
 0x116   :  { %1706 = vmatprep.subr.bf16.mxu0 %v2235_v43  ;;  %1747 = vmatprep.subr.bf16.mxu1 %v2238_v58 }
 0x119   :  { %1707 = vmatpush1.bf16.msra.mxu0 %v2233_v59  ;;  %1748 = vmatpush1.bf16.msra.mxu1 %v2236_v60  ;;  %v2598_v60 = vshrl.u32 %v51_v36, 7 }
 0x11a   :  { %1708 = vmatprep.subr.bf16.mxu0 %v2241_v61  ;;  %1749 = vmatprep.subr.bf16.mxu1 %v2244_v62  ;;  %v820_v61 = vld [vmem:[%s2647_s2] sm:$0xf] }
 0x11b   :  { %v821_v62 = vunpack.c.l.bf16 %v820_v61  ;;  %v2332_v61 = vld [vmem:[#allocation5 + $0x2a8] ss:$16 sps:$4 sm:$0xff]  }
 0x11d   :  { %1709 = vmatpush1.bf16.msra.mxu0 %v2239_v63  ;;  %1750 = vmatpush1.bf16.msra.mxu1 %v2242_v1  ;;  %v2604_v63 = vsub.s32 0, %v2598_v60  ;;  %v833_v1 = vsub.s32 4, %v2598_v60 }
 0x11e   :  { %1710 = vmatprep.subr.bf16.mxu0 %v2247_v2  ;;  %1751 = vmatprep.subr.bf16.mxu1 %v2250_v3  ;;  %v829_v2 = vsub.s32 2, %v2598_v60  ;;  %v837_v3 = vsub.s32 6, %v2598_v60 }
 0x11f   :  { %v834_v36 = vrot.slane %v821_v62, %v833_v1 }
 0x121   :  { %1711 = vmatpush1.bf16.msra.mxu0 %v2245_v4  ;;  %1752 = vmatpush1.bf16.msra.mxu1 %v2248_v5  ;;  %v826_v4 = vrot.slane %v821_v62, %v2604_v63  ;;  %v830_v5 = vrot.slane %v821_v62, %v829_v2 }
 0x122   :  { %1712 = vmatprep.subr.bf16.mxu0 %v2253_v6  ;;  %1753 = vmatprep.subr.bf16.mxu1 %v2256_v7  ;;  %v838_v6 = vrot.slane %v821_v62, %v837_v3  ;;  %v2337_v62 = vld [vmem:[#allocation5 + $0x8c] ss:$16 sps:$4 sm:$0xff]  }
 0x123   :  { %v846_v7 = vrot.slane %v826_v4, %v2604_v63  ;;  %v2340_v4 = vld [vmem:[#allocation5 + $0x28c] ss:$16 sps:$4 sm:$0xff]  }
 0x125   :  { %1713 = vmatpush1.bf16.msra.mxu0 %v2251_v48  ;;  %1754 = vmatpush1.bf16.msra.mxu1 %v2254_v8  ;;  %v854_v48 = vrot.slane %v834_v36, %v2604_v63  ;;  %v2335_v36 = vld [vmem:[#allocation5 + $0x88] ss:$16 sps:$4 sm:$0xff]  }
 0x126   :  { %1714 = vmatprep.subr.bf16.mxu0 %v2259_v9  ;;  %1755 = vmatprep.subr.bf16.mxu1 %v2262_v10 }
 0x129   :  { %1715 = vmatpush1.bf16.msra.mxu0 %v2257_v11  ;;  %1756 = vmatpush1.bf16.msra.mxu1 %v2260_v12  ;;  %v850_v12 = vrot.slane %v830_v5, %v2604_v63  ;;  %v2338_v5 = vld [vmem:[#allocation5 + $0x288] ss:$16 sps:$4 sm:$0xff]  }
 0x12a   :  { %1716 = vmatprep.subr.bf16.mxu0 %v2265_v13  ;;  %1757 = vmatprep.subr.bf16.mxu1 %v2268_v14  ;;  %v858_v13 = vrot.slane %v838_v6, %v2604_v63  ;;  %v2343_v6 = vld [vmem:[#allocation5 + $0x6c] ss:$16 sps:$4 sm:$0xff]  }
 0x12d   :  { %1717 = vmatpush1.bf16.msra.mxu0 %v2263_v15  ;;  %1758 = vmatpush1.bf16.msra.mxu1 %v2266_v16 }
 0x12e   :  { %1718 = vmatprep.subr.bf16.mxu0 %v2271_v17  ;;  %1759 = vmatprep.subr.bf16.mxu1 %v2274_v18 }
 0x131   :  { %1719 = vmatpush2.bf16.msra.mxu0 %v2269_v19  ;;  %1760 = vmatpush2.bf16.msra.mxu1 %v2272_v20 }
 0x132   :  { %1720 = vmatprep.subr.bf16.mxu0 %v2277_v21  ;;  %1761 = vmatprep.subr.bf16.mxu1 %v2280_v22 }
 0x135   :  { %1721 = vmatpush2.bf16.msra.mxu0 %v2275_v23  ;;  %1762 = vmatpush2.bf16.msra.mxu1 %v2278_v24 }
 0x136   :  { %1722 = vmatprep.subr.bf16.mxu0 %v2283_v25  ;;  %1763 = vmatprep.subr.bf16.mxu1 %v2286_v26 }
 0x139   :  { %1723 = vmatpush2.bf16.msra.mxu0 %v2281_v27  ;;  %1764 = vmatpush2.bf16.msra.mxu1 %v2284_v28 }
 0x13a   :  { %1724 = vmatprep.subr.bf16.mxu0 %v2289_v0  ;;  %1765 = vmatprep.subr.bf16.mxu1 %v2292_v29 }
 0x13d   :  { %1725 = vmatpush2.bf16.msra.mxu0 %v2287_v30  ;;  %1766 = vmatpush2.bf16.msra.mxu1 %v2290_v31 }
 0x13e   :  { %1726 = vmatprep.subr.bf16.mxu0 %v2295_v32  ;;  %1767 = vmatprep.subr.bf16.mxu1 %v2298_v33 }
 0x141   :  { %1727 = vmatpush2.bf16.msra.mxu0 %v2293_v34  ;;  %1768 = vmatpush2.bf16.msra.mxu1 %v2296_v35 }
 0x142   :  { %1728 = vmatprep.subr.bf16.mxu0 %v2301_v37  ;;  %1769 = vmatprep.subr.bf16.mxu1 %v2304_v38 }
 0x145   :  { %1729 = vmatpush2.bf16.msra.mxu0 %v2299_v39  ;;  %1770 = vmatpush2.bf16.msra.mxu1 %v2302_v40 }
 0x146   :  { %1730 = vmatprep.subr.bf16.mxu0 %v2307_v41  ;;  %1771 = vmatprep.subr.bf16.mxu1 %v2310_v42 }
 0x149   :  { %1731 = vmatpush2.bf16.msra.mxu0 %v2305_v44  ;;  %1772 = vmatpush2.bf16.msra.mxu1 %v2308_v45 }
 0x14a   :  { %1732 = vmatprep.subr.bf16.mxu0 %v2313_v46  ;;  %1773 = vmatprep.subr.bf16.mxu1 %v2316_v47 }
 0x14d   :  { %1733 = vmatpush2.bf16.msra.mxu0 %v2311_v49  ;;  %1774 = vmatpush2.bf16.msra.mxu1 %v2314_v50  ;;  %v2317_v49 = vld [vmem:[#allocation5 + $0xe8] ss:$16 sps:$4 sm:$0xff]  }
 0x14e   :  { %1784 = vmatprep.subr.bf16.mxu0 %v2319_v51  ;;  %1825 = vmatprep.subr.bf16.mxu1 %v2322_v52  ;;  %v2320_v52 = vld [vmem:[#allocation5 + $0x2e8] ss:$16 sps:$4 sm:$0xff]  }
 0x1b0   :  { %v530_v53 = vpop.f32.mrf.mxu0  ;;  %v571_v54 = vpop.f32.mrf.mxu1 }
 0x1b2   :  { %v532_v55 = vpop.f32.mrf.mxu0  ;;  %v573_v56 = vpop.f32.mrf.mxu1 }
 0x1b4   :  { %v534_v57 = vpop.f32.mrf.mxu0  ;;  %v575_v43 = vpop.f32.mrf.mxu1 }
 0x1b5   :  { %v2326_v57 = vld [vmem:[#allocation5 + $0x2c8] ss:$16 sps:$4 sm:$0xff]   ;;  %v2331_v43 = vld [vmem:[#allocation5 + $0xac] ss:$16 sps:$4 sm:$0xff]  }
 0x1b6   :  { %v535_v58 = vpop.f32.mrf.mxu0  ;;  %v576_v59 = vpop.f32.mrf.mxu1 }
 0x1b7   :  { %v2334_v58 = vld [vmem:[#allocation5 + $0x2ac] ss:$16 sps:$4 sm:$0xff]   ;;  %v2329_v59 = vld [vmem:[#allocation5 + $0xa8] ss:$16 sps:$4 sm:$0xff]  }
 0x1d0   :  { %v772_v8 = vpop.f32.mrf.mxu0  ;;  %v813_v9 = vpop.f32.mrf.mxu1 }
 0x1d1   :  { %v773_v10 = vadd.f32 %v772_v8, %v530_v53  ;;  %v814_v11 = vadd.f32 %v813_v9, %v571_v54  ;;  %v2325_v54 = vld [vmem:[#allocation5 + $0xcc] ss:$16 sps:$4 sm:$0xff]   ;;  %v2344_v8 = vld [vmem:[#allocation5 + $0x268] ss:$16 sps:$4 sm:$0xff]  }
 0x1d2   :  { %v774_v14 = vpop.f32.mrf.mxu0  ;;  %v815_v15 = vpop.f32.mrf.mxu1  ;;  %v2349_v9 = vld [vmem:[#allocation5 + $0x4c] ss:$16 sps:$4 sm:$0xff]  }
 0x1d3   :  { %v859_v16 = vadd.f32 %v846_v7, %v773_v10  ;;  %v861_v17 = vadd.f32 %v854_v48, %v814_v11  ;;  %v775_v18 = vadd.f32 %v774_v14, %v532_v55  ;;  %v816_v19 = vadd.f32 %v815_v15, %v573_v56  ;;  %v2328_v55 = vld [vmem:[#allocation5 + $0x2cc] ss:$16 sps:$4 sm:$0xff]   ;;  %v2323_v56 = vld [vmem:[#allocation5 + $0xc8] ss:$16 sps:$4 sm:$0xff]  }
 0x1d4   :  { %v776_v20 = vpop.f32.mrf.mxu0  ;;  %v817_v21 = vpop.f32.mrf.mxu1  ;;  %v2346_v7 = vld [vmem:[#allocation5 + $0x26c] ss:$16 sps:$4 sm:$0xff]   ;;  %v2341_v48 = vld [vmem:[#allocation5 + $0x68] ss:$16 sps:$4 sm:$0xff]  }
 0x1d5   :  { %v1972_v22 = vmul.f32 -1.442695, %v859_v16  ;;  %v1974_v23 = vmul.f32 -1.442695, %v861_v17  ;;  %v860_v24 = vadd.f32 %v850_v12, %v775_v18  ;;  %v862_v25 = vadd.f32 %v858_v13, %v816_v19  ;;  %v2352_v10 = vld [vmem:[#allocation5 + $0x24c] ss:$16 sps:$4 sm:$0xff]  }
 0x1d6   :  { %v777_v26 = vpop.f32.mrf.mxu0  ;;  %v818_v27 = vpop.f32.mrf.mxu1  ;;  %v2347_v11 = vld [vmem:[#allocation5 + $0x48] ss:$16 sps:$4 sm:$0xff]   ;;  %v2355_v13 = vld [vmem:[#allocation5 + $0x2c] ss:$16 sps:$4 sm:$0xff]  }
 0x1d7   :  { %2419 = vpow2.f32 %v1972_v22  ;;  %v1973_v28 = vmul.f32 -1.442695, %v860_v24  ;;  %v1975_v0 = vmul.f32 -1.442695, %v862_v25  ;;  %v2350_v12 = vld [vmem:[#allocation5 + $0x248] ss:$16 sps:$4 sm:$0xff]  }
 0x1d8   :  { %2421 = vpow2.f32 %v1974_v23  ;;  %v2358_v14 = vld [vmem:[#allocation5 + $0x22c] ss:$16 sps:$4 sm:$0xff]   ;;  %v2353_v15 = vld [vmem:[#allocation5 + $0x28] ss:$16 sps:$4 sm:$0xff]  }
 0x1d9   :  { %2423 = vpow2.f32 %v1973_v28  ;;  %v2364_v18 = vld [vmem:[#allocation5 + $0x20c] ss:$16 sps:$4 sm:$0xff]   ;;  %v2359_v19 = vld [vmem:[#allocation5 + $0x8] ss:$16 sps:$4 sm:$0xff]  }
 0x1da   :  { %2425 = vpow2.f32 %v1975_v0  ;;  %v2362_v20 = vld [vmem:[#allocation5 + $0x208] ss:$16 sps:$4 sm:$0xff]   ;;  %v2367_v21 = vld [vmem:[#allocation5 + $0x1ec] ss:$16 sps:$4 sm:$0xff]  }
 0x1db   :  { %v2370_v22 = vld [vmem:[#allocation5 + $0x3ec] ss:$16 sps:$4 sm:$0xff]   ;;  %v2365_v23 = vld [vmem:[#allocation5 + $0x1e8] ss:$16 sps:$4 sm:$0xff]  }
 0x1dc   :  { %v2376_v26 = vld [vmem:[#allocation5 + $0x3cc] ss:$16 sps:$4 sm:$0xff]   ;;  %v2371_v27 = vld [vmem:[#allocation5 + $0x1c8] ss:$16 sps:$4 sm:$0xff]  }
 0x1dd   :  { %v2374_v28 = vld [vmem:[#allocation5 + $0x3c8] ss:$16 sps:$4 sm:$0xff]   ;;  %v2379_v0 = vld [vmem:[#allocation5 + $0x1ac] ss:$16 sps:$4 sm:$0xff]  }
 0x1e4   :  { %v2420_v29 = vpop.eup %2419 }
 0x1e5   :  { %v2422_v30 = vpop.eup %2421  ;;  %v875_v31 = vadd.f32 1.0, %v2420_v29  ;;  %v2382_v29 = vld [vmem:[#allocation5 + $0x3ac] ss:$16 sps:$4 sm:$0xff]  }
 0x1e6   :  { %v2424_v32 = vpop.eup %2423  ;;  %v877_v33 = vadd.f32 1.0, %v2422_v30  ;;  %v2377_v30 = vld [vmem:[#allocation5 + $0x1a8] ss:$16 sps:$4 sm:$0xff]  }
 0x1e7   :  { %v2426_v34 = vpop.eup %2425  ;;  %2427 = vrcp.f32 %v875_v31  ;;  %v876_v35 = vadd.f32 1.0, %v2424_v32  ;;  %v2380_v31 = vld [vmem:[#allocation5 + $0x3a8] ss:$16 sps:$4 sm:$0xff]   ;;  %v2385_v32 = vld [vmem:[#allocation5 + $0x18c] ss:$16 sps:$4 sm:$0xff]  }
 0x1e8   :  { %2429 = vrcp.f32 %v877_v33  ;;  %v878_v37 = vadd.f32 1.0, %v2426_v34  ;;  %v2388_v33 = vld [vmem:[#allocation5 + $0x38c] ss:$16 sps:$4 sm:$0xff]   ;;  %v2383_v34 = vld [vmem:[#allocation5 + $0x188] ss:$16 sps:$4 sm:$0xff]  }
 0x1e9   :  { %2431 = vrcp.f32 %v876_v35  ;;  %v2386_v35 = vld [vmem:[#allocation5 + $0x388] ss:$16 sps:$4 sm:$0xff]  }
 0x1ea   :  { %2433 = vrcp.f32 %v878_v37  ;;  %v2391_v37 = vld [vmem:[#allocation5 + $0x16c] ss:$16 sps:$4 sm:$0xff]  }
 0x1f4   :  { %v2428_v38 = vpop.eup %2427 }
 0x1f5   :  { %v2430_v39 = vpop.eup %2429  ;;  %v887_v41 = vmul.f32 %v2428_v38, %v859_v16  ;;  %v2356_v16 = vld [vmem:[#allocation5 + $0x228] ss:$16 sps:$4 sm:$0xff]   ;;  %v2394_v38 = vld [vmem:[#allocation5 + $0x36c] ss:$16 sps:$4 sm:$0xff]  }
 0x1f6   :  { %v2432_v40 = vpop.eup %2431  ;;  %v889_v44 = vmul.f32 %v2430_v39, %v861_v17  ;;  %v2361_v17 = vld [vmem:[#allocation5 + $0xc] ss:$16 sps:$4 sm:$0xff]   ;;  %v2389_v39 = vld [vmem:[#allocation5 + $0x168] ss:$16 sps:$4 sm:$0xff]  }
 0x1f7   :  { %v2434_v42 = vpop.eup %2433  ;;  %v888_v45 = vmul.f32 %v2432_v40, %v860_v24  ;;  %v2620_v50 = vpack.c.bf16 %v887_v41, %v887_v41  ;;  %v2368_v24 = vld [vmem:[#allocation5 + $0x3e8] ss:$16 sps:$4 sm:$0xff]   ;;  %v2397_v41 = vld [vmem:[#allocation5 + $0x14c] ss:$16 sps:$4 sm:$0xff]  }
 0x1f8   :  { %v890_v46 = vmul.f32 %v2434_v42, %v862_v25  ;;  %v2622_v53 = vpack.c.bf16 %v889_v44, %v889_v44  ;;  %v2373_v25 = vld [vmem:[#allocation5 + $0x1cc] ss:$16 sps:$4 sm:$0xff]   ;;  %v2392_v40 = vld [vmem:[#allocation5 + $0x368] ss:$16 sps:$4 sm:$0xff]  }
 0x1f9   :  { %v892_v47 = vpack.c.bf16 %v888_v45, %v888_v45  ;;  %v2400_v42 = vld [vmem:[#allocation5 + $0x34c] ss:$16 sps:$4 sm:$0xff]   ;;  %v2395_v44 = vld [vmem:[#allocation5 + $0x148] ss:$16 sps:$4 sm:$0xff]  }
 0x1fa   :  { %v894_v51 = vpack.c.bf16 %v890_v46, %v890_v46  ;;  %v2398_v45 = vld [vmem:[#allocation5 + $0x348] ss:$16 sps:$4 sm:$0xff]   ;;  %v2403_v46 = vld [vmem:[#allocation5 + $0x12c] ss:$16 sps:$4 sm:$0xff]  }
 0x1fb   :  { %1734 = vmatprep.mubr.bf16.mxu0 %v892_v47 }
 0x1fc   :  { %1775 = vmatprep.mubr.bf16.mxu1 %v894_v51  ;;  %1735 = vmatmul.mubr.bf16.vlgmr.msra.gmra.mxu0 %v2620_v50 }
 0x1fd   :  { %1776 = vmatmul.mubr.bf16.vlgmr.msra.gmra.mxu1 %v2622_v53  ;;  %1785 = vmatpush1.bf16.msra.mxu0 %v2317_v49  ;;  %v2401_v49 = vld [vmem:[#allocation5 + $0x128] ss:$16 sps:$4 sm:$0xff]  }
 0x1fe   :  { %1826 = vmatpush1.bf16.msra.mxu1 %v2320_v52  ;;  %1816 = vmatprep.mubr.bf16.mxu0 %v892_v47  ;;  %v2406_v47 = vld [vmem:[#allocation5 + $0x32c] ss:$16 sps:$4 sm:$0xff]  }
 0x1ff   :  { %1857 = vmatprep.mubr.bf16.mxu1 %v894_v51  ;;  %1786 = vmatprep.subr.bf16.mxu0 %v2325_v54  ;;  %v2404_v51 = vld [vmem:[#allocation5 + $0x328] ss:$16 sps:$4 sm:$0xff]   ;;  %v2409_v52 = vld [vmem:[#allocation5 + $0x10c] ss:$16 sps:$4 sm:$0xff]  }
 0x200   :  { %1827 = vmatprep.subr.bf16.mxu1 %v2328_v55  ;;  %v2412_v54 = vld [vmem:[#allocation5 + $0x30c] ss:$16 sps:$4 sm:$0xff]   ;;  %v2407_v55 = vld [vmem:[#allocation5 + $0x108] ss:$16 sps:$4 sm:$0xff]  }
 0x201   :  { %1787 = vmatpush1.bf16.msra.mxu0 %v2323_v56  ;;  %v2410_v56 = vld [vmem:[#allocation5 + $0x308] ss:$16 sps:$4 sm:$0xff]  }
 0x202   :  { %1828 = vmatpush1.bf16.msra.mxu1 %v2326_v57  ;;  %1788 = vmatprep.subr.bf16.mxu0 %v2331_v43  ;;  %v1023_v57 = vld [vmem:[%s2649_s4] sm:$0xf]  ;;  %s2512_s4 = smov [#allocation7]  }
 0x203   :  { %1829 = vmatprep.subr.bf16.mxu1 %v2334_v58  ;;  %v1024_v43 = vunpack.c.l.bf16 %v1023_v57  ;;  %s1890_s7 = sshll.u32 %s2512_s4, 4  ;;  %s1891_s7 = int_to_ptr.vmem [resolvable:$true] %s1890_s7 }
 0x204   :  { %s2475_s8 = scalar_lea.vmem %s1891_s7, 256  ;;  %p2480_p11 = scmp.lt.s32.totalorder %s1891_s7, %s1891_s7 }
 0x205   :  { %1789 = vmatpush1.bf16.msra.mxu0 %v2329_v59  ;;  %v1029_v58 = vrot.slane %v1024_v43, %v2604_v63  ;;  %v1033_v59 = vrot.slane %v1024_v43, %v829_v2  ;;  %v1037_v2 = vrot.slane %v1024_v43, %v833_v1  ;;  %p2476_p10 = scmp.ne.s32.totalorder %s1891_s7, %s2475_s8  ;;  %p2481_p12 = scmp.lt.s32.totalorder %s2475_s8, %s2475_s8 }
 0x206   :  { %1830 = vmatpush1.bf16.msra.mxu1 %v2332_v61  ;;  %1790 = vmatprep.subr.bf16.mxu0 %v2337_v62 }
 0x207   :  { %1831 = vmatprep.subr.bf16.mxu1 %v2340_v4  ;;  %v1049_v61 = vrot.slane %v1029_v58, %v2604_v63  ;;  %v1053_v62 = vrot.slane %v1033_v59, %v2604_v63  ;;  %p2482_p13 = por %p2481_p12, %p2480_p11 }
 0x209   :  { %1791 = vmatpush1.bf16.msra.mxu0 %v2335_v36  ;;  %p2483_p0 = pnand %p2482_p13, %p2476_p10 }
 0x20a   :  { %1832 = vmatpush1.bf16.msra.mxu1 %v2338_v5  ;;  %1792 = vmatprep.subr.bf16.mxu0 %v2343_v6 }
 0x20b   :  { %1833 = vmatprep.subr.bf16.mxu1 %v2346_v7 }
 0x20d   :  { %1793 = vmatpush1.bf16.msra.mxu0 %v2341_v48 }
 0x20e   :  { %1834 = vmatpush1.bf16.msra.mxu1 %v2344_v8  ;;  %1794 = vmatprep.subr.bf16.mxu0 %v2349_v9 }
 0x20f   :  { %1835 = vmatprep.subr.bf16.mxu1 %v2352_v10 }
 0x211   :  { %1795 = vmatpush1.bf16.msra.mxu0 %v2347_v11 }
 0x212   :  { %1836 = vmatpush1.bf16.msra.mxu1 %v2350_v12  ;;  %1796 = vmatprep.subr.bf16.mxu0 %v2355_v13  ;;  %v1041_v13 = vrot.slane %v1024_v43, %v837_v3 }
 0x213   :  { %1837 = vmatprep.subr.bf16.mxu1 %v2358_v14  ;;  %v1057_v14 = vrot.slane %v1037_v2, %v2604_v63 }
 0x215   :  { %1797 = vmatpush1.bf16.msra.mxu0 %v2353_v15  ;;  %v1061_v15 = vrot.slane %v1041_v13, %v2604_v63 }
 0x216   :  { %1838 = vmatpush1.bf16.msra.mxu1 %v2356_v16  ;;  %1798 = vmatprep.subr.bf16.mxu0 %v2361_v17 }
 0x217   :  { %1839 = vmatprep.subr.bf16.mxu1 %v2364_v18 }
 0x219   :  { %1799 = vmatpush1.bf16.msra.mxu0 %v2359_v19 }
 0x21a   :  { %1840 = vmatpush1.bf16.msra.mxu1 %v2362_v20  ;;  %1800 = vmatprep.subr.bf16.mxu0 %v2367_v21 }
 0x21b   :  { %1841 = vmatprep.subr.bf16.mxu1 %v2370_v22 }
 0x21d   :  { %1801 = vmatpush2.bf16.msra.mxu0 %v2365_v23 }
 0x21e   :  { %1842 = vmatpush2.bf16.msra.mxu1 %v2368_v24  ;;  %1802 = vmatprep.subr.bf16.mxu0 %v2373_v25 }
 0x21f   :  { %1843 = vmatprep.subr.bf16.mxu1 %v2376_v26 }
 0x221   :  { %1803 = vmatpush2.bf16.msra.mxu0 %v2371_v27 }
 0x222   :  { %1844 = vmatpush2.bf16.msra.mxu1 %v2374_v28  ;;  %1804 = vmatprep.subr.bf16.mxu0 %v2379_v0 }
 0x223   :  { %1845 = vmatprep.subr.bf16.mxu1 %v2382_v29 }
 0x225   :  { %1805 = vmatpush2.bf16.msra.mxu0 %v2377_v30 }
 0x226   :  { %1846 = vmatpush2.bf16.msra.mxu1 %v2380_v31  ;;  %1806 = vmatprep.subr.bf16.mxu0 %v2385_v32 }
 0x227   :  { %1847 = vmatprep.subr.bf16.mxu1 %v2388_v33 }
 0x229   :  { %1807 = vmatpush2.bf16.msra.mxu0 %v2383_v34 }
 0x22a   :  { %1848 = vmatpush2.bf16.msra.mxu1 %v2386_v35  ;;  %1808 = vmatprep.subr.bf16.mxu0 %v2391_v37 }
 0x22b   :  { %1849 = vmatprep.subr.bf16.mxu1 %v2394_v38 }
 0x22d   :  { %1809 = vmatpush2.bf16.msra.mxu0 %v2389_v39 }
 0x22e   :  { %1850 = vmatpush2.bf16.msra.mxu1 %v2392_v40  ;;  %1810 = vmatprep.subr.bf16.mxu0 %v2397_v41 }
 0x22f   :  { %1851 = vmatprep.subr.bf16.mxu1 %v2400_v42 }
 0x231   :  { %1811 = vmatpush2.bf16.msra.mxu0 %v2395_v44 }
 0x232   :  { %1852 = vmatpush2.bf16.msra.mxu1 %v2398_v45  ;;  %1812 = vmatprep.subr.bf16.mxu0 %v2403_v46 }
 0x233   :  { %1853 = vmatprep.subr.bf16.mxu1 %v2406_v47 }
 0x235   :  { %1813 = vmatpush2.bf16.msra.mxu0 %v2401_v49 }
 0x236   :  { %1854 = vmatpush2.bf16.msra.mxu1 %v2404_v51  ;;  %1814 = vmatprep.subr.bf16.mxu0 %v2409_v52 }
 0x237   :  { %1855 = vmatprep.subr.bf16.mxu1 %v2412_v54 }
 0x239   :  { %1815 = vmatpush2.bf16.msra.mxu0 %v2407_v55 }
 0x23a   :  { %1856 = vmatpush2.bf16.msra.mxu1 %v2410_v56 }
 0x23c   :  { %1817 = vmatmul.mubr.bf16.vlgmr.msra.gmra.mxu0 %v2620_v50 }
 0x23d   :  { %1858 = vmatmul.mubr.bf16.vlgmr.msra.gmra.mxu1 %v2622_v53 }
 0x2bc   :  { %v1736_v4 = vpop.f32.mrf.mxu0 }
 0x2bd   :  { %v1737_v36 = vadd.f32 %v1736_v4, %v1049_v61  ;;  %v1777_v5 = vpop.f32.mrf.mxu1 }
 0x2be   :  { %v1738_v50 = vpop.f32.mrf.mxu0 }
 0x2bf   :  { %v1739_v6 = vadd.f32 %v1738_v50, %v1053_v62  ;;  %v1779_v53 = vpop.f32.mrf.mxu1  ;;  %v1778_v48 = vadd.f32 %v1777_v5, %v1737_v36 }
 0x2c0   :  { %v1740_v7 = vpop.f32.mrf.mxu0 }
 0x2c1   :  { %v1780_v8 = vadd.f32 %v1779_v53, %v1739_v6  ;;  %v1781_v9 = vpop.f32.mrf.mxu1 }
 0x2c2   :  { %v1741_v10 = vpop.f32.mrf.mxu0 }
 0x2c3   :  { %v2106_v11 = vpack.c.bf16 %v1780_v8, %v1778_v48  ;;  %v1782_v12 = vpop.f32.mrf.mxu1 }
 0x2c5   :  { %1882 = vst [vmem:[#allocation7] sm:$0xff] %v2106_v11 }
 0x2fc   :  { %v1818_v16 = vpop.f32.mrf.mxu0 }
 0x2fd   :  { %v1819_v17 = vadd.f32 %v1818_v16, %v1057_v14  ;;  %v1859_v18 = vpop.f32.mrf.mxu1 }
 0x2fe   :  { %v1820_v19 = vpop.f32.mrf.mxu0 }
 0x2ff   :  { %v1821_v20 = vadd.f32 %v1820_v19, %v1061_v15  ;;  %v1861_v21 = vpop.f32.mrf.mxu1  ;;  %v1860_v23 = vadd.f32 %v1859_v18, %v1819_v17 }
 0x300   :  { %v1822_v22 = vpop.f32.mrf.mxu0 }
 0x301   :  { %v1862_v24 = vadd.f32 %v1861_v21, %v1821_v20  ;;  %v1863_v25 = vpop.f32.mrf.mxu1 }
 0x302   :  { %v1823_v1 = vpop.f32.mrf.mxu0 }
 0x303   :  { %v2107_v26 = vpack.c.bf16 %v1862_v24, %v1860_v23  ;;  %v1864_v60 = vpop.f32.mrf.mxu1 }
 0x305   :  { %1883 = vst [vmem:[#allocation7 + $0x8] sm:$0xff] %v2107_v26 }
 0x306   :  { %2486 = shalt.err (!%p2483_p0)
}
 0x307   :  { %1893 = dma.vmem_to_hbm [thread:$0]  %s1891_s7, 256, %s2650_s5, [#allocation4]  }
 0x308   :  { %2499 = dma.done.wait [#allocation4], 256  }
 0x309   :  { %2500 = vsyncadd [#allocation4], 4294967040 }
 0x30a   :  { %1897 = vsyncpa [#allocation3], 1 }
 0x30b   :  { %1898 = vsyncpa [#allocation6], 1 }
 0x30c   :  { %1899 = vsyncpa [#allocation4], 1 }

</bundles_post_ra>
